<compile_context>
chip_gen: v5e
topology: v5e:2x2
jax: 0.10.0
libtpu: 0.0.40
codegen_flags: <defaults>
</compile_context>

<pallas_src>
import math
import functools

import numpy as np
import jax
import jax.numpy as jnp
from jax import lax
from jax.experimental import pallas as pl
from jax.experimental.pallas import tpu as pltpu

EPS = 1e-5  # PyTorch GroupNorm default eps


def _pick_tile(total, target):
    """Largest lane-friendly tile <= target that divides total (else the full dim)."""
    if total <= target:
        return total
    for cand in range(target, 127, -1):
        if total % cand == 0 and cand % 128 == 0:
            return cand
    return total


def _block_bytes(shape, dtype):
    return int(np.prod(shape)) * jnp.dtype(dtype).itemsize


def _vmem_limit(block_bytes, scratch_bytes=0):
    # double-buffered in/out blocks + scratch + slack, clamped to what every TPU
    # generation can grant (v7x physical VMEM is 64 MiB).
    est = 2 * sum(block_bytes) + scratch_bytes + (8 << 20)
    return int(min(max(est, 32 << 20), 64 << 20))


# ----------------------- kernel 1: condition collapse + GN stats -----------------------
def _collapse_stats_kernel(*refs, num_modules):
    M = num_modules
    x_ref = refs[0]
    cond_refs = refs[1:1 + M]
    wc_refs = refs[1 + M:1 + 2 * M]
    bc_ref = refs[1 + 2 * M]
    cond_out_ref = refs[1 + 2 * M + 1]
    stats_ref = refs[1 + 2 * M + 2]

    @pl.when(pl.program_id(1) == 0)
    def _():
        stats_ref[...] = jnp.zeros_like(stats_ref)

    x = x_ref[0]                                               # (C, tt) f32

    # collapse_conditions: fused concat + 1x1 conv (sum of per-module matmuls).
    cond = None
    for m in range(M):
        term = jnp.dot(wc_refs[m][...], cond_refs[m][0],       # bf16 x bf16 -> f32
                       preferred_element_type=jnp.float32)
        cond = term if cond is None else cond + term
    cond = cond + bc_ref[...]                                  # (C, tt) f32
    cond_out_ref[0] = cond.astype(cond_out_ref.dtype)

    # Per-channel partial sums for GroupNorm statistics (single-pass sum / sumsq,
    # accumulated over T tiles).  Group aggregation + affine fold happen on the
    # host: it is only O(B*C) work.
    s = jnp.concatenate(
        [jnp.sum(x, axis=1, keepdims=True),
         jnp.sum(x * x, axis=1, keepdims=True),
         jnp.sum(cond, axis=1, keepdims=True),
         jnp.sum(cond * cond, axis=1, keepdims=True)], axis=1)  # (C, 4)
    stats_ref[0] = stats_ref[0] + s


# ----------------------- kernel 2: GroupNorm fold + q / kv 1x1 convs -------------------
def _proj_kernel(x_ref, cond_ref, fold_ref, wq_ref, bq_ref, wkv_ref, bkv_ref,
                 qkv_ref):
    C = x_ref.shape[1]
    f = fold_ref[0]                                            # (C, 4) f32
    a_x, b_x = f[:, 0:1], f[:, 1:2]
    a_c, b_c = f[:, 2:3], f[:, 3:4]

    xn = (x_ref[0] * a_x + b_x).astype(jnp.bfloat16)                       # GN(x)
    cn = (cond_ref[0].astype(jnp.float32) * a_c + b_c).astype(jnp.bfloat16)  # GN(cond)

    q = jnp.dot(wq_ref[...], cn, preferred_element_type=jnp.float32) + bq_ref[...]
    kv = jnp.dot(wkv_ref[...], xn, preferred_element_type=jnp.float32) + bkv_ref[...]

    # PyTorch concat order [q ; kv] so the attention kernel's per-head blocks are
    # pure row-block index arithmetic (legacy QKVAttention channel mixing).
    qkv_ref[0, :C, :] = q.astype(qkv_ref.dtype)
    qkv_ref[0, C:, :] = kv.astype(qkv_ref.dtype)


# --------------- kernel 3: flash attention + proj_out + residual (per head) ------------
def _attn_proj_kernel(q_ref, k_ref, v_ref, wp_ref, bp_ref, x_ref, o_ref,
                      m_sc, l_sc, acc_sc, oacc_sc):
    h = pl.program_id(2)
    ki = pl.program_id(3)
    nh = pl.num_programs(2)
    nk = pl.num_programs(3)

    @pl.when(jnp.logical_and(h == 0, ki == 0))
    def _():
        oacc_sc[...] = jnp.zeros_like(oacc_sc)

    @pl.when(ki == 0)
    def _():
        m_sc[...] = jnp.full_like(m_sc, -jnp.inf)
        l_sc[...] = jnp.zeros_like(l_sc)
        acc_sc[...] = jnp.zeros_like(acc_sc)

    q = q_ref[0]                                               # (ch, tq) bf16, pre-scaled
    k = k_ref[0]                                               # (ch, tk) bf16
    v = v_ref[0]                                               # (ch, tk) bf16

    # Scores in (T_k, T_q) orientation: softmax reduces along sublanes, the PV
    # product is a plain matmul and the output stays (C, T) lane-dense.
    s = lax.dot_general(k, q, (((0,), (0,)), ((), ())),
                        preferred_element_type=jnp.float32)    # (tk, tq)
    m_prev = m_sc[...]
    m_new = jnp.maximum(m_prev, jnp.max(s, axis=0, keepdims=True))
    alpha = jnp.exp(m_prev - m_new)
    # NOTE: exp kept f32 so the kernel is accurate on v5e too; bf16 exp is a
    # possible EUP micro-opt on v6e/v7x.
    p = jnp.exp(s - m_new)                                     # (tk, tq) f32
    l_sc[...] = alpha * l_sc[...] + jnp.sum(p, axis=0, keepdims=True)
    acc_sc[...] = alpha * acc_sc[...] + jnp.dot(
        v, p.astype(jnp.bfloat16), preferred_element_type=jnp.float32)
    m_sc[...] = m_new

    @pl.when(ki == nk - 1)
    def _():
        # Deferred softmax normalization on the (ch, tq) accumulator, then fold
        # this head straight into the resident proj_out accumulator.
        a_h = acc_sc[...] * pl.reciprocal(l_sc[...], approx=False)
        oacc_sc[...] += lax.dot_general(
            wp_ref[0], a_h.astype(jnp.bfloat16), (((0,), (0,)), ((), ())),
            preferred_element_type=jnp.float32)                # (C, tq)

    @pl.when(jnp.logical_and(h == nh - 1, ki == nk - 1))
    def _():
        o_ref[0] = (x_ref[0] + oacc_sc[...] + bp_ref[...]).astype(o_ref.dtype)


# ------------------------------------ wrapper ------------------------------------------
def multi_cross_attention_block(x, conditions, params, *, num_heads,
                                num_groups=32, proj_tile=512, q_tile=1024,
                                kv_tile=512):
    """x: (B, C, H, W); conditions: list of (B, C, H, W).  Returns (B, C, H, W)."""
    B, C, Hs, Ws = x.shape
    T = Hs * Ws
    M = len(conditions)
    assert M >= 1
    assert C % num_groups == 0, "channels must be divisible by num_groups"
    assert C % num_heads == 0, "channels must be divisible by num_heads"
    ch = C // num_heads
    assert ch % 8 == 0, "head dim must be a multiple of 8 for TPU sublane tiles"
    G = num_groups
    cg = C // G
    for c in conditions:
        assert c.shape == x.shape

    f32, bf16 = jnp.float32, jnp.bfloat16

    # PyTorch-native (B, C, T) orientation: pure reshapes, no HBM transposes.
    x_ct = x.reshape(B, C, T).astype(f32)
    conds_ct = [c.reshape(B, C, T).astype(bf16) for c in conditions]  # bf16: halves DMA

    # ---------------------------- host-side weight prep ----------------------------
    wc = params["wc"]
    wc_m = [wc[:, m * C:(m + 1) * C].astype(bf16) for m in range(M)]
    bc = params["bc"].reshape(C, 1).astype(f32)

    # Fold the attention scale (scale*scale = 1/sqrt(ch)) into the q-role rows of
    # the [q ; kv] concat (legacy head mixing -> rows [3*ch*h, 3*ch*h + ch)).
    svec = np.ones(3 * C, np.float32)
    for h in range(num_heads):
        svec[3 * ch * h: 3 * ch * h + ch] = 1.0 / math.sqrt(ch)
    svec = jnp.asarray(svec)
    wq = (params["wq"] * svec[:C, None]).astype(bf16)
    bq = (params["bq"] * svec[:C]).reshape(C, 1).astype(f32)
    wkv = (params["wkv"] * svec[C:, None]).astype(bf16)
    bkv = (params["bkv"] * svec[C:]).reshape(2 * C, 1).astype(f32)

    # proj_out weight in per-head layout: wp_heads[h, j, o] = Wp[o, h*ch + j].
    wp_heads = jnp.transpose(params["wp"].reshape(C, num_heads, ch),
                             (1, 2, 0)).astype(bf16)            # (H, ch, C)
    bp = params["bp"].reshape(C, 1).astype(f32)
    gamma = params["gn_w"].astype(f32)
    beta = params["gn_b"].astype(f32)

    # ----------------- kernel 1: condition collapse + GroupNorm statistics ----------
    tt = _pick_tile(T, proj_tile)
    nt = T // tt
    act_blk = (1, C, tt)
    k1_blocks = ([_block_bytes(act_blk, f32)]
                 + [_block_bytes(act_blk, bf16)] * M
                 + [_block_bytes((C, C), bf16)] * M
                 + [_block_bytes(act_blk, bf16), _block_bytes((1, C, 4), f32)])
    cond_bf, stats = pl.pallas_call(
        functools.partial(_collapse_stats_kernel, num_modules=M),
        out_shape=(jax.ShapeDtypeStruct((B, C, T), bf16),
                   jax.ShapeDtypeStruct((B, C, 4), f32)),
        grid_spec=pltpu.PrefetchScalarGridSpec(
            num_scalar_prefetch=0,
            grid=(B, nt),
            in_specs=([pl.BlockSpec(act_blk, lambda b, t: (b, 0, t))]
                      + [pl.BlockSpec(act_blk, lambda b, t: (b, 0, t))] * M
                      + [pl.BlockSpec((C, C), lambda b, t: (0, 0))] * M
                      + [pl.BlockSpec((C, 1), lambda b, t: (0, 0))]),
            out_specs=(pl.BlockSpec(act_blk, lambda b, t: (b, 0, t)),
                       pl.BlockSpec((1, C, 4), lambda b, t: (b, 0, 0))),
        ),
        compiler_params=pltpu.CompilerParams(
            dimension_semantics=("parallel", "arbitrary"),
            vmem_limit_bytes=_vmem_limit(k1_blocks)),
    )(x_ct, *conds_ct, *wc_m, bc)

    # ---------- tiny host glue: GroupNorm mean/var -> per-channel scale & shift -----
    n = float(cg * T)

    def _fold(s1, s2):
        gmean = s1.reshape(B, G, cg).sum(-1) / n                       # (B, G)
        gvar = jnp.maximum(s2.reshape(B, G, cg).sum(-1) / n - gmean * gmean, 0.0)
        rstd = lax.rsqrt(gvar + EPS)
        mean_c = jnp.repeat(gmean, cg, axis=1)                         # (B, C)
        rstd_c = jnp.repeat(rstd, cg, axis=1)
        a = rstd_c * gamma[None, :]
        b = beta[None, :] - mean_c * a
        return a, b

    a_x, b_x = _fold(stats[:, :, 0], stats[:, :, 1])
    a_c, b_c = _fold(stats[:, :, 2], stats[:, :, 3])
    folds = jnp.stack([a_x, b_x, a_c, b_c], axis=-1)                   # (B, C, 4)

    # ---------------- kernel 2: q / kv 1x1 convs -> qkv (legacy order), bf16 --------
    k2_blocks = [_block_bytes(act_blk, f32), _block_bytes(act_blk, bf16),
                 _block_bytes((1, C, 4), f32), _block_bytes((C, C), bf16),
                 _block_bytes((C, 1), f32), _block_bytes((2 * C, C), bf16),
                 _block_bytes((2 * C, 1), f32), _block_bytes((1, 3 * C, tt), bf16)]
    qkv = pl.pallas_call(
        _proj_kernel,
        out_shape=jax.ShapeDtypeStruct((B, 3 * C, T), bf16),
        grid_spec=pltpu.PrefetchScalarGridSpec(
            num_scalar_prefetch=0,
            grid=(B, nt),
            in_specs=[pl.BlockSpec(act_blk, lambda b, t: (b, 0, t)),
                      pl.BlockSpec(act_blk, lambda b, t: (b, 0, t)),
                      pl.BlockSpec((1, C, 4), lambda b, t: (b, 0, 0)),
                      pl.BlockSpec((C, C), lambda b, t: (0, 0)),
                      pl.BlockSpec((C, 1), lambda b, t: (0, 0)),
                      pl.BlockSpec((2 * C, C), lambda b, t: (0, 0)),
                      pl.BlockSpec((2 * C, 1), lambda b, t: (0, 0))],
            out_specs=pl.BlockSpec((1, 3 * C, tt), lambda b, t: (b, 0, t)),
        ),
        compiler_params=pltpu.CompilerParams(
            dimension_semantics=("parallel", "parallel"),
            vmem_limit_bytes=_vmem_limit(k2_blocks)),
    )(x_ct, cond_bf, folds, wq, bq, wkv, bkv)

    # ------------- kernel 3: flash attention + proj_out + residual ------------------
    tq = _pick_tile(T, q_tile)
    tk = _pick_tile(T, kv_tile)
    nq = T // tq
    nk = T // tk
    k3_blocks = [_block_bytes((1, ch, tq), bf16),
                 2 * _block_bytes((1, ch, tk), bf16),
                 _block_bytes((1, ch, C), bf16),
                 _block_bytes((C, 1), f32),
                 _block_bytes((1, C, tq), f32),
                 _block_bytes((1, C, tq), x.dtype)]
    k3_scratch = (2 * _block_bytes((1, tq), f32)
                  + _block_bytes((ch, tq), f32) + _block_bytes((C, tq), f32)
                  + 6 * _block_bytes((tk, tq), f32))            # score/exp temporaries
    out = pl.pallas_call(
        _attn_proj_kernel,
        out_shape=jax.ShapeDtypeStruct((B, C, T), x.dtype),
        grid_spec=pltpu.PrefetchScalarGridSpec(
            num_scalar_prefetch=0,
            grid=(B, nq, num_heads, nk),
            in_specs=[pl.BlockSpec((1, ch, tq), lambda b, qi, h, ki: (b, 3 * h, qi)),
                      pl.BlockSpec((1, ch, tk), lambda b, qi, h, ki: (b, 3 * h + 1, ki)),
                      pl.BlockSpec((1, ch, tk), lambda b, qi, h, ki: (b, 3 * h + 2, ki)),
                      pl.BlockSpec((1, ch, C), lambda b, qi, h, ki: (h, 0, 0)),
                      pl.BlockSpec((C, 1), lambda b, qi, h, ki: (0, 0)),
                      pl.BlockSpec((1, C, tq), lambda b, qi, h, ki: (b, 0, qi))],
            out_specs=pl.BlockSpec((1, C, tq), lambda b, qi, h, ki: (b, 0, qi)),
            scratch_shapes=[pltpu.VMEM((1, tq), jnp.float32),
                            pltpu.VMEM((1, tq), jnp.float32),
                            pltpu.VMEM((ch, tq), jnp.float32),
                            pltpu.VMEM((C, tq), jnp.float32)],
        ),
        compiler_params=pltpu.CompilerParams(
            dimension_semantics=("parallel", "parallel", "arbitrary", "arbitrary"),
            vmem_limit_bytes=_vmem_limit(k3_blocks, k3_scratch)),
    )(qkv, qkv, qkv, wp_heads, bp, x_ct)

    return out.reshape(B, C, Hs, Ws)


# --------------------------------- pure-JAX reference ----------------------------------
def reference(x, conditions, params, *, num_heads, num_groups=32):
    B, C, Hs, Ws = x.shape
    T = Hs * Ws
    cond_cat = jnp.concatenate(conditions, axis=1)
    cond = jnp.einsum("oi,bihw->bohw", params["wc"], cond_cat) + params["bc"][None, :, None, None]

    xf = x.reshape(B, C, T)
    condf = cond.reshape(B, C, T)

    def gn(z):
        zg = z.reshape(B, num_groups, C // num_groups, T)
        mean = zg.mean(axis=(2, 3), keepdims=True)
        var = zg.var(axis=(2, 3), keepdims=True)
        zn = ((zg - mean) / jnp.sqrt(var + EPS)).reshape(B, C, T)
        return zn * params["gn_w"][None, :, None] + params["gn_b"][None, :, None]

    q = jnp.einsum("oi,bit->bot", params["wq"], gn(condf)) + params["bq"][None, :, None]
    kv = jnp.einsum("oi,bit->bot", params["wkv"], gn(xf)) + params["bkv"][None, :, None]
    qkv = jnp.concatenate([q, kv], axis=1)                                # (B, 3C, T)

    ch = C // num_heads
    qkv_h = qkv.reshape(B * num_heads, 3 * ch, T)
    qh, kh, vh = qkv_h[:, :ch], qkv_h[:, ch:2 * ch], qkv_h[:, 2 * ch:]
    scale = 1.0 / math.sqrt(math.sqrt(ch))
    w = jnp.einsum("bct,bcs->bts", qh * scale, kh * scale)
    w = jax.nn.softmax(w, axis=-1)
    a = jnp.einsum("bts,bcs->bct", w, vh).reshape(B, C, T)

    h = jnp.einsum("oi,bit->bot", params["wp"], a) + params["bp"][None, :, None]
    return (xf + h).reshape(B, C, Hs, Ws)


if __name__ == "__main__":
    # Small shapes consistent with the module (T = 256 -> lane-dense, ch = 16).
    B, C, Hs, Ws = 2, 64, 16, 16
    num_modules = 2
    num_heads = 4
    num_groups = 32   # normalization(channels) == GroupNorm32(32, channels)

    key = jax.random.PRNGKey(0)
    keys = jax.random.split(key, 16)

    x = jax.random.normal(keys[0], (B, C, Hs, Ws), jnp.float32)
    conditions = [
        jax.random.normal(keys[1 + m], (B, C, Hs, Ws), jnp.float32)
        for m in range(num_modules)
    ]

    # NOTE: the real proj_out is zero-initialized (zero_module); small random
    # values are used here so the attention path is actually exercised.
    params = {
        "wc":   0.1 * jax.random.normal(keys[4], (C, num_modules * C), jnp.float32),
        "bc":   0.05 * jax.random.normal(keys[5], (C,), jnp.float32),
        "gn_w": 1.0 + 0.1 * jax.random.normal(keys[6], (C,), jnp.float32),
        "gn_b": 0.1 * jax.random.normal(keys[7], (C,), jnp.float32),
        "wq":   0.1 * jax.random.normal(keys[8], (C, C), jnp.float32),
        "bq":   0.05 * jax.random.normal(keys[9], (C,), jnp.float32),
        "wkv":  0.1 * jax.random.normal(keys[10], (2 * C, C), jnp.float32),
        "bkv":  0.05 * jax.random.normal(keys[11], (2 * C,), jnp.float32),
        "wp":   0.1 * jax.random.normal(keys[12], (C, C), jnp.float32),
        "bp":   0.05 * jax.random.normal(keys[13], (C,), jnp.float32),
    }

    out = multi_cross_attention_block(x, conditions, params,
                                      num_heads=num_heads, num_groups=num_groups)
    out = jax.block_until_ready(out)

    ref = jax.block_until_ready(
        reference(x, conditions, params, num_heads=num_heads, num_groups=num_groups))

    # qkv is stored bf16 and all matmuls feed the MXU with bf16 operands
    # (f32 accumulation); compare with bf16-level tolerance.
    np.testing.assert_allclose(np.asarray(out), np.asarray(ref), rtol=3e-2, atol=3e-2)
    print("KERNEL_OK")
</pallas_src>

<mosaic_0001>
module attributes {stable_mosaic.version = 11 : i64} {
  func.func @_collapse_stats_kernel(%arg0: i32, %arg1: i32, %arg2: memref<1x64x256xf32, #tpu.memory_space<vmem>>, %arg3: memref<1x64x256xbf16, #tpu.memory_space<vmem>>, %arg4: memref<1x64x256xbf16, #tpu.memory_space<vmem>>, %arg5: memref<64x64xbf16, #tpu.memory_space<vmem>>, %arg6: memref<64x64xbf16, #tpu.memory_space<vmem>>, %arg7: memref<64x1xf32, #tpu.memory_space<vmem>>, %arg8: memref<1x64x256xbf16, #tpu.memory_space<vmem>>, %arg9: memref<1x64x4xf32, #tpu.memory_space<vmem>>) attributes {dimension_semantics = [#tpu.dimension_semantics<parallel>, #tpu.dimension_semantics<arbitrary>], iteration_bounds = array<i64: 2, 1>, scalar_prefetch = 0 : i64, scratch_operands = 0 : i64, tpu.core_type = #tpu.core_type<tc>, window_params = [{transform_indices = @transform_0, window_bounds = array<i64: 1, 64, 256>}, {transform_indices = @transform_1, window_bounds = array<i64: 1, 64, 256>}, {transform_indices = @transform_2, window_bounds = array<i64: 1, 64, 256>}, {pipeline_mode = #tpu.pipeline_mode<synchronous>, transform_indices = @transform_3, window_bounds = array<i64: 64, 64>}, {pipeline_mode = #tpu.pipeline_mode<synchronous>, transform_indices = @transform_4, window_bounds = array<i64: 64, 64>}, {pipeline_mode = #tpu.pipeline_mode<synchronous>, transform_indices = @transform_5, window_bounds = array<i64: 64, 1>}, {transform_indices = @transform_6, window_bounds = array<i64: 1, 64, 256>}, {transform_indices = @transform_7, window_bounds = array<i64: 1, 64, 4>}]} {
    %c0_i32 = arith.constant 0 : i32
    %0 = arith.cmpi eq, %arg1, %c0_i32 : i32
    %1 = arith.extui %0 : i1 to i32
    %c0_i32_0 = arith.constant 0 : i32
    %2 = arith.cmpi ne, %1, %c0_i32_0 : i32
    scf.if %2 {
      %cst_29 = arith.constant 0.000000e+00 : f32
      %38 = vector.broadcast %cst_29 : f32 to vector<1x64x4xf32>
      %c0_30 = arith.constant 0 : index
      %c0_31 = arith.constant 0 : index
      %c0_32 = arith.constant 0 : index
      %39 = vector.load %arg9[%c0_30, %c0_31, %c0_32] : memref<1x64x4xf32, #tpu.memory_space<vmem>>, vector<1x64x4xf32>
      tpu.vector_store %arg9[%c0_30, %c0_31, %c0_32], %38 {strides = array<i32>} : memref<1x64x4xf32, #tpu.memory_space<vmem>>, vector<1x64x4xf32>,
    } else {
    }
    %c0 = arith.constant 0 : index
    %c0_1 = arith.constant 0 : index
    %c0_2 = arith.constant 0 : index
    %3 = vector.load %arg2[%c0, %c0_1, %c0_2] : memref<1x64x256xf32, #tpu.memory_space<vmem>>, vector<1x64x256xf32>
    %4 = vector.shape_cast %3 : vector<1x64x256xf32> to vector<64x256xf32>
    %c0_3 = arith.constant 0 : index
    %c0_4 = arith.constant 0 : index
    %5 = vector.load %arg5[%c0_3, %c0_4] : memref<64x64xbf16, #tpu.memory_space<vmem>>, vector<64x64xbf16>
    %c0_5 = arith.constant 0 : index
    %c0_6 = arith.constant 0 : index
    %c0_7 = arith.constant 0 : index
    %6 = vector.load %arg3[%c0_5, %c0_6, %c0_7] : memref<1x64x256xbf16, #tpu.memory_space<vmem>>, vector<1x64x256xbf16>
    %7 = vector.shape_cast %6 : vector<1x64x256xbf16> to vector<64x256xbf16>
    %cst = arith.constant dense<0.000000e+00> : vector<64x256xf32>
    %8 = tpu.matmul %5, %7, %cst {dimension_numbers = #tpu.dot_dimension_numbers<[1], [0], [0], [1], [0, 0, 1, 1], [], []>} : vector<64x64xbf16>, vector<64x256xbf16>, vector<64x256xf32> -> vector<64x256xf32>
    %c0_8 = arith.constant 0 : index
    %c0_9 = arith.constant 0 : index
    %9 = vector.load %arg6[%c0_8, %c0_9] : memref<64x64xbf16, #tpu.memory_space<vmem>>, vector<64x64xbf16>
    %c0_10 = arith.constant 0 : index
    %c0_11 = arith.constant 0 : index
    %c0_12 = arith.constant 0 : index
    %10 = vector.load %arg4[%c0_10, %c0_11, %c0_12] : memref<1x64x256xbf16, #tpu.memory_space<vmem>>, vector<1x64x256xbf16>
    %11 = vector.shape_cast %10 : vector<1x64x256xbf16> to vector<64x256xbf16>
    %cst_13 = arith.constant dense<0.000000e+00> : vector<64x256xf32>
    %12 = tpu.matmul %9, %11, %cst_13 {dimension_numbers = #tpu.dot_dimension_numbers<[1], [0], [0], [1], [0, 0, 1, 1], [], []>} : vector<64x64xbf16>, vector<64x256xbf16>, vector<64x256xf32> -> vector<64x256xf32>
    %13 = arith.addf %8, %12 : vector<64x256xf32>
    %c0_14 = arith.constant 0 : index
    %c0_15 = arith.constant 0 : index
    %14 = vector.load %arg7[%c0_14, %c0_15] : memref<64x1xf32, #tpu.memory_space<vmem>>, vector<64x1xf32>
    %15 = vector.broadcast %14 : vector<64x1xf32> to vector<64x256xf32>
    %16 = arith.addf %13, %15 : vector<64x256xf32>
    %17 = arith.truncf %16 : vector<64x256xf32> to vector<64x256xbf16>
    %c0_16 = arith.constant 0 : index
    %c0_17 = arith.constant 0 : index
    %c0_18 = arith.constant 0 : index
    %18 = vector.load %arg8[%c0_16, %c0_17, %c0_18] : memref<1x64x256xbf16, #tpu.memory_space<vmem>>, vector<1x64x256xbf16>
    %19 = vector.shape_cast %18 : vector<1x64x256xbf16> to vector<64x256xbf16>
    %20 = vector.shape_cast %17 : vector<64x256xbf16> to vector<1x64x256xbf16>
    tpu.vector_store %arg8[%c0_16, %c0_17, %c0_18], %20 {strides = array<i32>} : memref<1x64x256xbf16, #tpu.memory_space<vmem>>, vector<1x64x256xbf16>,
    %cst_19 = arith.constant dense<0.000000e+00> : vector<64xf32>
    %21 = vector.multi_reduction <add>, %4, %cst_19 [1] : vector<64x256xf32> to vector<64xf32>
    %22 = vector.shape_cast %21 : vector<64xf32> to vector<64x1xf32>
    %23 = arith.mulf %4, %4 : vector<64x256xf32>
    %cst_20 = arith.constant dense<0.000000e+00> : vector<64xf32>
    %24 = vector.multi_reduction <add>, %23, %cst_20 [1] : vector<64x256xf32> to vector<64xf32>
    %25 = vector.shape_cast %24 : vector<64xf32> to vector<64x1xf32>
    %cst_21 = arith.constant dense<0.000000e+00> : vector<64xf32>
    %26 = vector.multi_reduction <add>, %16, %cst_21 [1] : vector<64x256xf32> to vector<64xf32>
    %27 = vector.shape_cast %26 : vector<64xf32> to vector<64x1xf32>
    %28 = arith.mulf %16, %16 : vector<64x256xf32>
    %cst_22 = arith.constant dense<0.000000e+00> : vector<64xf32>
    %29 = vector.multi_reduction <add>, %28, %cst_22 [1] : vector<64x256xf32> to vector<64xf32>
    %30 = vector.shape_cast %29 : vector<64xf32> to vector<64x1xf32>
    %31 = tpu.concatenate %22, %25, %27, %30 in 1 : vector<64x1xf32>, vector<64x1xf32>, vector<64x1xf32>, vector<64x1xf32> -> vector<64x4xf32>
    %c0_23 = arith.constant 0 : index
    %c0_24 = arith.constant 0 : index
    %c0_25 = arith.constant 0 : index
    %32 = vector.load %arg9[%c0_23, %c0_24, %c0_25] : memref<1x64x4xf32, #tpu.memory_space<vmem>>, vector<1x64x4xf32>
    %33 = vector.shape_cast %32 : vector<1x64x4xf32> to vector<64x4xf32>
    %34 = arith.addf %33, %31 : vector<64x4xf32>
    %c0_26 = arith.constant 0 : index
    %c0_27 = arith.constant 0 : index
    %c0_28 = arith.constant 0 : index
    %35 = vector.load %arg9[%c0_26, %c0_27, %c0_28] : memref<1x64x4xf32, #tpu.memory_space<vmem>>, vector<1x64x4xf32>
    %36 = vector.shape_cast %35 : vector<1x64x4xf32> to vector<64x4xf32>
    %37 = vector.shape_cast %34 : vector<64x4xf32> to vector<1x64x4xf32>
    tpu.vector_store %arg9[%c0_26, %c0_27, %c0_28], %37 {strides = array<i32>} : memref<1x64x4xf32, #tpu.memory_space<vmem>>, vector<1x64x4xf32>,
    return
  }
  func.func @transform_0(%arg0: i32, %arg1: i32) -> (i32, i32, i32) {
    %c0_i32 = arith.constant 0 : i32
    %c0_i32_0 = arith.constant 0 : i32
    return %arg0, %c0_i32, %arg1 : i32, i32, i32
  }
  func.func @transform_1(%arg0: i32, %arg1: i32) -> (i32, i32, i32) {
    %c0_i32 = arith.constant 0 : i32
    %c0_i32_0 = arith.constant 0 : i32
    return %arg0, %c0_i32, %arg1 : i32, i32, i32
  }
  func.func @transform_2(%arg0: i32, %arg1: i32) -> (i32, i32, i32) {
    %c0_i32 = arith.constant 0 : i32
    %c0_i32_0 = arith.constant 0 : i32
    return %arg0, %c0_i32, %arg1 : i32, i32, i32
  }
  func.func @transform_3(%arg0: i32, %arg1: i32) -> (i32, i32) {
    %c0_i32 = arith.constant 0 : i32
    %c0_i32_0 = arith.constant 0 : i32
    %c0_i32_1 = arith.constant 0 : i32
    return %c0_i32, %c0_i32_0 : i32, i32
  }
  func.func @transform_4(%arg0: i32, %arg1: i32) -> (i32, i32) {
    %c0_i32 = arith.constant 0 : i32
    %c0_i32_0 = arith.constant 0 : i32
    %c0_i32_1 = arith.constant 0 : i32
    return %c0_i32, %c0_i32_0 : i32, i32
  }
  func.func @transform_5(%arg0: i32, %arg1: i32) -> (i32, i32) {
    %c0_i32 = arith.constant 0 : i32
    %c0_i32_0 = arith.constant 0 : i32
    %c0_i32_1 = arith.constant 0 : i32
    return %c0_i32, %c0_i32_0 : i32, i32
  }
  func.func @transform_6(%arg0: i32, %arg1: i32) -> (i32, i32, i32) {
    %c0_i32 = arith.constant 0 : i32
    %c0_i32_0 = arith.constant 0 : i32
    return %arg0, %c0_i32, %arg1 : i32, i32, i32
  }
  func.func @transform_7(%arg0: i32, %arg1: i32) -> (i32, i32, i32) {
    %c0_i32 = arith.constant 0 : i32
    %c0_i32_0 = arith.constant 0 : i32
    %c0_i32_1 = arith.constant 0 : i32
    return %arg0, %c0_i32, %c0_i32_0 : i32, i32, i32
  }
}

</mosaic_0001>

<bundles_post_ra>
// kernel: tpu_custom_call.1
= control target key start
LH: loop header
LB: loop body
LE: loop exit
PB: predicated region body
PF: predicated region fallthrough
CT: control target
= control target key end

     0   :  { %s2063_s0 = inlined_call_operand.hbm [shape: f32[2,64,256], index: 0, kind: input, shape index: {}]   ;;  %s2064_s1 = inlined_call_operand.hbm [shape: bf16[2,64,256], index: 1, kind: input, shape index: {}]   ;;  %s2065_s2 = inlined_call_operand.hbm [shape: bf16[2,64,256], index: 2, kind: input, shape index: {}]   ;;  %s2066_s3 = inlined_call_operand.vmem [shape: bf16[64,64], index: 3, kind: input, shape index: {}]   ;;  %s2067_s4 = inlined_call_operand.vmem [shape: bf16[64,64], index: 4, kind: input, shape index: {}]   ;;  %s2068_s5 = inlined_call_operand.vmem [shape: f32[64,1], index: 5, kind: input, shape index: {}]   ;;  %s2069_s6 = inlined_call_operand.hbm [shape: bf16[2,64,256], index: 6, kind: output, shape index: {0}]   ;;  %s2070_s7 = inlined_call_operand.vmem [shape: f32[2,64,4], index: 7, kind: output, shape index: {1}]  }
   0x1   :  { %2076 = sst [smem:[#allocation18_spill]] %s2064_s1 }
   0x2   :  { %2077 = sst [smem:[#allocation19_spill]] %s2065_s2 }
   0x3   :  { %2078 = sst [smem:[#allocation20_spill]] %s2070_s7 }
   0x4   :  { %13 = vsyncpa [#allocation3], 0 }
   0x5   :  { %15 = vsyncpa [#allocation3 + $0x1], 0 }
   0x6   :  { %16 = vsyncpa [#allocation6], 0 }
   0x7   :  { %18 = vsyncpa [#allocation6 + $0x1], 0 }
   0x8   :  { %19 = vsyncpa [#allocation4], 0 }
   0x9   :  { %21 = vsyncpa [#allocation4 + $0x1], 0  ;;  %s1668_s24 = smov 0   ;;  %s1670_s25 = smov 0  }
   0xa   :  { %s1672_s26 = smov 0   ;;  %s1674_s27 = smov 0  }
   0xb   :  { %s1676_s28 = smov 0   ;;  %s1678_s29 = smov 0  }
   0xc LB: > { %2079 = sst [smem:[#allocation12_spill]] %s1598_s24  ;;  %s1699_s30 = sadd.s32 4294967295, %s1618_s29   ;;  %s1618_s29 = sphi %s1678_s29, %s27_s29   ;;  %s1614_s28 = sphi %s1676_s28, %s2099_s28   ;;  %s1610_s27 = sphi %s1674_s27, %s2098_s27   ;;  %s1606_s26 = sphi %s1672_s26, %s2097_s26   ;;  %s1602_s25 = sphi %s1670_s25, %s2101_s25   ;;  %s1598_s24 = sphi %s1668_s24, %s2100_s24  }
   0xd   : > { %2080 = sst [smem:[#allocation13_spill]] %s1606_s26  ;;  %s1194_s8 = sadd.s32 4294967294, %s1618_s29  }
   0xe   : > { %2081 = sst [smem:[#allocation14_spill]] %s1614_s28  ;;  %s39_s9 = sadd.s32 1, %s1614_s28 }
   0xf   : > { %s48_s10 = sadd.s32 1, %s1606_s26  ;;  %p41_p0 = scmp.ge.s32.totalorder %s39_s9, 2 }
  0x10   : > { %p55_p1 = scmp.ne.s32.totalorder %s1606_s26, %s1602_s25  ;;  %p56_p2 = scmp.eq.s32.totalorder %s1618_s29, 0 }
  0x11   : > { %p61_p3 = scmp.ne.s32.totalorder %s1602_s25, %s1598_s24  ;;  %s2103_s9 = smov (%p41_p0, %s39_s9), 0 }
  0x12   : > { %2082 = sst [smem:[#allocation15_spill]] %s2103_s9  ;;  %p1711_p4 = por %p56_p2, %p55_p1 }
  0x13   : > { %p62_p5 = scmp.eq.s32.totalorder %s1699_s30, 0  ;;  %s43_s12 = ssub.s32 %s1614_s28, %s2103_s9 }
  0x14   : > { %p206_p6 = scmp.eq.s32.totalorder %s1699_s30, 1  ;;  %p46_p7 = scmp.eq.s32.totalorder %s43_s12, 0 }
  0x15   : > { %p1719_p8 = por %p62_p5, %p61_p3  ;;  %p212_p10 = scmp.eq.s32.totalorder %s1194_s8, 1 }
  0x16   : > { %p1723_p9 = por %p206_p6, %p55_p1  ;;  %p1196_p12 = scmp.ge.s32.totalorder %s1618_s29, 2 }
  0x17   : > { %s1728_s15 = scalar_select %p46_p7, %s1606_s26, %s48_s10  }
  0x18   : > { %p1730_p11 = por %p212_p10, %p61_p3  ;;  %p1381_p13 = scmp.lt.s32.totalorder %s1618_s29, 2 }
  0x19   : > { %2086 = sst [smem:[#allocation16_spill]] %s1728_s15  ;;  %s1737_s17 = sand.u32 1, %s1606_s26  }
  0x1a   : > { %s2087_s16 = scalar_select %p1730_p11, 1, 0 }
  0x1b   : > { %s291_s18 = sand.u32 1, %s1618_s29   ;;  %s1200_s19 = sshll.u32 %s1737_s17, 6 }
  0x1c   : > { %2088 = sst [smem:[#allocation17_spill]] %s2087_s16  ;;  %p1743_p0 = pnand %p1381_p13, %p1711_p4 }
  0x1d   : > { %s1331_s21 = sshll.u32 %s1614_s28, 6  ;;  %s2090_s1 = sld [smem:[#allocation18_spill]] }
  0x1e   : > { %s295_s12 = scalar_lea.vmem [#allocation5], %s1200_s19  ;;  %s1751_s11 = scalar_lea.sflag [#allocation6], %s291_s18 }
  0x1f   : > { %s305_s9 = sshll.u32 %s295_s12, 4  ;;  %s1620_s15 = smov 128   ;;  %s306_s9 = int_to_ptr.vmem [resolvable:$true] %s305_s9 }
  0x20   : > { %s1621_s26 = smov 8   ;;  %s2091_s2 = sld [smem:[#allocation19_spill]] }
  0x21   : > { %p1206_p1 = scmp.ge.s32.totalorder %s1618_s29, 1  ;;  %p337_p2 = scmp.lt.s32.totalorder %s1618_s29, 3 }
  0x22   : > { %s1623_s7 = smov 16  }
  0x23   : > { %s302_s8 = scalar_lea.hbm %s2090_s1, %s1331_s21  ;;  %p1761_p3 = pnand %p1206_p1, %p337_p2 }
  0x24   : > { %s303_s10 = sshll.u32 %s302_s8, 4  ;;  %s319_s8 = scalar_lea.vmem [#allocation7], %s1200_s19  ;;  %s304_s10 = int_to_ptr.hbm [resolvable:$true] %s303_s10 }
  0x25   : > { %1373 = dma.hbm_to_vmem [thread:$0]  (!%p1743_p0), %s304_s10, 1024, %s306_s9, %s1751_s11, %s1620_s15, %s1620_s15, %s1621_s26  }
  0x26   : > { %s326_s22 = scalar_lea.hbm %s2091_s2, %s1331_s21  ;;  %s329_s1 = sshll.u32 %s319_s8, 4  ;;  %s330_s1 = int_to_ptr.vmem [resolvable:$true] %s329_s1 }
  0x27   : > { %s327_s23 = sshll.u32 %s326_s22, 4  ;;  %s1197_s9 = sshll.u32 %s1737_s17, 7  ;;  %s328_s23 = int_to_ptr.hbm [resolvable:$true] %s327_s23 }
  0x28   : > { %s1330_s10 = sshll.u32 %s1614_s28, 7  ;;  %s271_s19 = scalar_lea.vmem [#allocation2], %s1197_s9 }
  0x29   : > { %s278_s16 = scalar_lea.hbm %s2063_s0, %s1330_s10  ;;  %s281_s22 = sshll.u32 %s271_s19, 4  ;;  %s282_s22 = int_to_ptr.vmem [resolvable:$true] %s281_s22 }
  0x2a   : > { %s279_s21 = sshll.u32 %s278_s16, 4  ;;  %s268_s8 = scalar_lea.sflag [#allocation3], %s1737_s17  ;;  %s280_s21 = int_to_ptr.hbm [resolvable:$true] %s279_s21 }
  0x2b   : > { %s1622_s2 = smov 256   ;;  %341 = sbr.rel (%p1761_p3) target bundleno = 396 (0x18c), region = 44 }
  0x2c   : > { %1370 = dma.hbm_to_vmem [thread:$0]  (!%p1743_p0), %s280_s21, 2048, %s282_s22, %s268_s8, %s1622_s2, %s1622_s2, %s1623_s7  }
  0x2d   : > { %1376 = dma.hbm_to_vmem [thread:$0]  (!%p1743_p0), %s328_s23, 1024, %s330_s1, %s1751_s11, %s1620_s15, %s1620_s15, %s1621_s26  }
  0x2e   : > { %s1779_s28 = sand.u32 (!%p1761_p3), 1, %s1602_s25  }
  0x2f   : > { %s1207_s9 = sshll.u32 (!%p1761_p3), %s1779_s28, 7  ;;  %s344_s10 = scalar_lea.sflag (!%p1761_p3), [#allocation3], %s1779_s28 }
  0x30   : > { %s1783_s12 = scalar_lea.vmem [#allocation2], %s1207_s9 }
  0x31   : > { %1585 = dma.done.wait (%p1719_p8), %s344_s10, 2048  }
  0x32   : > { %1587 = vsyncadd (%p1719_p8), %s344_s10, 4294965248  ;;  %s353_s1 = sand.u32 1, %s1699_s30   ;;  %s1791_s2 = sshll.u32 %s1779_s28, 6 }
  0x33   : > { %s354_s7 = scalar_lea.sflag [#allocation6], %s353_s1  ;;  %s1794_s26 = scalar_lea.vmem [#allocation5], %s1791_s2 }
  0x34   : > { %1589 = dma.done.wait (%p1719_p8), %s354_s7, 2048  }
  0x35   : > { %1591 = vsyncadd (%p1719_p8), %s354_s7, 4294965248  ;;  %s1801_s15 = scalar_lea.vmem [#allocation7], %s1791_s2  ;;  %v1311_v5 = vld [vmem:[%s1794_s26 + $0x30] sm:$0xf]  ;;  %v1345_v6 = vld [vmem:[%s1794_s26 + $0x34] sm:$0xf0] }
  0x36   : > { %v1255_v0 = vld [vmem:[%s1801_s15 + $0x30] sm:$0xf]  ;;  %v1357_v1 = vld [vmem:[%s1801_s15 + $0x34] sm:$0xf0]  ;;  %v1356_v2 = vld [vmem:[%s1801_s15 + $0x34] sm:$0xf]  ;;  %v1312_v8 = vor.u32 %v1345_v6, %v1311_v5 }
  0x37   : > { %v1256_v3 = vor.u32 %v1357_v1, %v1255_v0  ;;  %v1257_v4 = vld [vmem:[%s1801_s15 + $0x38] sm:$0xf0]  ;;  %v1344_v9 = vld [vmem:[%s1794_s26 + $0x34] sm:$0xf]  ;;  %v1247_v11 = vld [vmem:[%s1801_s15 + $0x20] sm:$0xf] }
  0x38   : > { %v1260_v7 = vor.u32 %v1356_v2, %v1257_v4  ;;  %v1313_v10 = vld [vmem:[%s1794_s26 + $0x38] sm:$0xf0]  ;;  %v1355_v13 = vld [vmem:[%s1801_s15 + $0x24] sm:$0xf0]  ;;  %v1354_v14 = vld [vmem:[%s1801_s15 + $0x24] sm:$0xf]  ;;  %692 = vmatpush.bf16.msra.mxu2 %v1312_v8 }
  0x39   : > { %562 = vmatpush.bf16.msra.mxu0 %v1256_v3  ;;  %v1316_v12 = vor.u32 %v1344_v9, %v1313_v10  ;;  %v1249_v15 = vld [vmem:[%s1801_s15 + $0x28] sm:$0xf0]  ;;  %v1248_v16 = vor.u32 %v1355_v13, %v1247_v11  ;;  %v1303_v18 = vld [vmem:[%s1794_s26 + $0x20] sm:$0xf]  ;;  %v1343_v19 = vld [vmem:[%s1794_s26 + $0x24] sm:$0xf0] }
  0x3a   : > { %591 = vmatpush.bf16.msra.mxu1 %v1260_v7  ;;  %v1252_v17 = vor.u32 %v1354_v14, %v1249_v15  ;;  %v1342_v20 = vld [vmem:[%s1794_s26 + $0x24] sm:$0xf]  ;;  %v1304_v21 = vor.u32 %v1343_v19, %v1303_v18  ;;  %v1305_v22 = vld [vmem:[%s1794_s26 + $0x28] sm:$0xf0]  ;;  %v1239_v23 = vld [vmem:[%s1801_s15 + $0x10] sm:$0xf] }
  0x3b   : > { %721 = vmatpush.bf16.msra.mxu3 %v1316_v12  ;;  %v1353_v24 = vld [vmem:[%s1801_s15 + $0x14] sm:$0xf0]  ;;  %v1308_v25 = vor.u32 %v1342_v20, %v1305_v22  ;;  %v1352_v26 = vld [vmem:[%s1801_s15 + $0x14] sm:$0xf]  ;;  %v1241_v27 = vld [vmem:[%s1801_s15 + $0x18] sm:$0xf0] }
  0x3c   : > { %v1295_v28 = vld [vmem:[%s1794_s26 + $0x10] sm:$0xf]  ;;  %v1240_v29 = vor.u32 %v1353_v24, %v1239_v23  ;;  %v1341_v30 = vld [vmem:[%s1794_s26 + $0x14] sm:$0xf0]  ;;  %v1340_v31 = vld [vmem:[%s1794_s26 + $0x14] sm:$0xf]  ;;  %693 = vmatpush.bf16.msra.mxu2 %v1304_v21  ;;  %v1244_v33 = vor.u32 %v1352_v26, %v1241_v27 }
  0x3d   : > { %563 = vmatpush.bf16.msra.mxu0 %v1248_v16  ;;  %v1297_v32 = vld [vmem:[%s1794_s26 + $0x18] sm:$0xf0]  ;;  %v1296_v34 = vor.u32 %v1341_v30, %v1295_v28  ;;  %v1231_v35 = vld [vmem:[%s1801_s15] sm:$0xf]  ;;  %v1351_v36 = vld [vmem:[%s1801_s15 + $0x4] sm:$0xf0] }
  0x3e   : > { %592 = vmatpush.bf16.msra.mxu1 %v1252_v17  ;;  %v1350_v37 = vld [vmem:[%s1801_s15 + $0x4] sm:$0xf]  ;;  %v1300_v38 = vor.u32 %v1340_v31, %v1297_v32  ;;  %v1233_v39 = vld [vmem:[%s1801_s15 + $0x8] sm:$0xf0]  ;;  %v1287_v40 = vld [vmem:[%s1794_s26] sm:$0xf]  ;;  %v1232_v44 = vor.u32 %v1351_v36, %v1231_v35 }
  0x3f   : > { %722 = vmatpush.bf16.msra.mxu3 %v1308_v25  ;;  %v1339_v41 = vld [vmem:[%s1794_s26 + $0x4] sm:$0xf0]  ;;  %v1338_v42 = vld [vmem:[%s1794_s26 + $0x4] sm:$0xf]  ;;  %v1289_v43 = vld [vmem:[%s1794_s26 + $0x8] sm:$0xf0]  ;;  %v1236_v46 = vor.u32 %v1350_v37, %v1233_v39 }
  0x40   : > { %v1624_v45 = vmov 0   ;;  %694 = vmatpush.bf16.msra.mxu2 %v1296_v34  ;;  %v1288_v47 = vor.u32 %v1339_v41, %v1287_v40  ;;  %v746_v48 = vld [vmem:[%s2068_s5] sm:$0xff]  ;;  %v1292_v49 = vor.u32 %v1338_v42, %v1289_v43  ;;  %vm545_vm0 = vcmask 523264   ;;  %v747_v52 = vld [vmem:[%s2068_s5 + $0x8] sm:$0xff]  ;;  %v748_v53 = vld [vmem:[%s2068_s5 + $0x10] sm:$0xff]  ;;  %s1007_s15 = scalar_lea.sflag [#allocation4], %s1779_s28 }
  0x41   : > { %564 = vmatpush.bf16.msra.mxu0 %v1240_v29  ;;  %1439 = vset.pattern.permute.xlu0 %v1624_v45  ;;  %v1346_v50 = vld [vmem:[%s2067_s4] sm:$0xff]  ;;  %v752_v55 = vld [vmem:[%s2068_s5 + $0x30] sm:$0xff]  ;;  %v749_v56 = vld [vmem:[%s2068_s5 + $0x18] sm:$0xff]  ;;  %s1552_s11 = scalar_lea.hbm %s2069_s6, 128 }
  0x42   : > { %593 = vmatpush.bf16.msra.mxu1 %v1244_v33  ;;  %756 = vperm.xlu0 %1439, %v746_v48   ;;  %v1334_v51 = vld [vmem:[%s2066_s3] sm:$0xff]  ;;  %v1347_v57 = vld [vmem:[%s2067_s4 + $0x8] sm:$0xff]  ;;  %v753_v60 = vld [vmem:[%s2068_s5 + $0x38] sm:$0xff] }
  0x43   : > { %723 = vmatpush.bf16.msra.mxu3 %v1300_v38  ;;  %1440 = vset.pattern.permute.xlu1 %v1624_v45  ;;  %v750_v54 = vld [vmem:[%s2068_s5 + $0x20] sm:$0xff]  ;;  %v1335_v58 = vld [vmem:[%s2066_s3 + $0x8] sm:$0xff]  ;;  %v1348_v61 = vld [vmem:[%s2067_s4 + $0x10] sm:$0xff] }
  0x44   : > { %1441 = vset.pattern.permute.xlu2 %v1624_v45  ;;  %695 = vmatpush.bf16.msra.mxu2 %v1288_v47  ;;  %v751_v59 = vld [vmem:[%s2068_s5 + $0x28] sm:$0xff]  ;;  %v1336_v62 = vld [vmem:[%s2066_s3 + $0x10] sm:$0xff]  ;;  %v1349_v63 = vld [vmem:[%s2067_s4 + $0x18] sm:$0xff] }
  0x45   : > { %565 = vmatpush.bf16.msra.mxu0 %v1232_v44  ;;  %766 = vperm.xlu1 %1440, %v748_v53   ;;  %v1337_v0 = vld [vmem:[%s2066_s3 + $0x18] sm:$0xff]  ;;  %v439_v1 = vld [vmem:[%s1783_s12 + $0x10] sm:$0xff]  ;;  %v437_v4 = vld [vmem:[%s1783_s12] sm:$0xff] }
  0x46   : > { %594 = vmatpush.bf16.msra.mxu1 %v1236_v46  ;;  %776 = vperm.xlu2 %1441, %v750_v54   ;;  %v440_v2 = vld [vmem:[%s1783_s12 + $0x18] sm:$0xff]  ;;  %v438_v5 = vld [vmem:[%s1783_s12 + $0x8] sm:$0xff]  ;;  %v441_v6 = vld [vmem:[%s1783_s12 + $0x20] sm:$0xff]  ;;  %v850_v15 = vmul.f32 %v437_v4, %v437_v4  ;;  %v852_v22 = vmul.f32 %v439_v1, %v439_v1 }
  0x47   : > { %724 = vmatpush.bf16.msra.mxu3 %v1292_v49  ;;  %1317 = vmatmul.msk.bf16.vlgmr.msra.gmra.mxu2 %vm545_vm0, %v1334_v51  ;;  %v829_v3 = vadd.f32 %v440_v2, %v439_v1  ;;  %v442_v7 = vld [vmem:[%s1783_s12 + $0x28] sm:$0xff]  ;;  %v447_v8 = vld [vmem:[%s1783_s12 + $0x50] sm:$0xff]  ;;  %v448_v9 = vld [vmem:[%s1783_s12 + $0x58] sm:$0xff]  ;;  %v826_v10 = vadd.f32 %v438_v5, %v437_v4  ;;  %v851_v16 = vmul.f32 %v438_v5, %v438_v5 }
  0x48   : > { %1261 = vmatmul.msk.bf16.vlgmr.msra.gmra.mxu0 %vm545_vm0, %v1346_v50  ;;  %v832_v11 = vadd.f32 %v442_v7, %v441_v6  ;;  %v841_v12 = vadd.f32 %v448_v9, %v447_v8  ;;  %v443_v13 = vld [vmem:[%s1783_s12 + $0x30] sm:$0xff]  ;;  %v444_v14 = vld [vmem:[%s1783_s12 + $0x38] sm:$0xff]  ;;  %v449_v17 = vld [vmem:[%s1783_s12 + $0x60] sm:$0xff]  ;;  %v853_v25 = vmul.f32 %v440_v2, %v440_v2  ;;  %v854_v37 = vmul.f32 %v441_v6, %v441_v6 }
  0x49   : > { %1265 = vmatmul.msk.bf16.vlgmr.msra.gmra.mxu1 %vm545_vm0, %v1346_v50  ;;  %v450_v18 = vld [vmem:[%s1783_s12 + $0x68] sm:$0xff]  ;;  %v835_v19 = vadd.f32 %v444_v14, %v443_v13  ;;  %v866_v21 = vadd.f32 %v851_v16, %v850_v15  ;;  %v445_v23 = vld [vmem:[%s1783_s12 + $0x40] sm:$0xff]  ;;  %v856_v26 = vmul.f32 %v443_v13, %v443_v13  ;;  %v857_v27 = vmul.f32 %v444_v14, %v444_v14  ;;  %v451_v31 = vld [vmem:[%s1783_s12 + $0x70] sm:$0xff] }
  0x4a   : > { %1321 = vmatmul.msk.bf16.vlgmr.msra.gmra.mxu3 %vm545_vm0, %v1334_v51  ;;  %761 = vperm.xlu0 %1439, %v747_v52   ;;  %v844_v20 = vadd.f32 %v450_v18, %v449_v17  ;;  %v446_v24 = vld [vmem:[%s1783_s12 + $0x48] sm:$0xff]  ;;  %v869_v29 = vadd.f32 %v853_v25, %v852_v22  ;;  %v452_v32 = vld [vmem:[%s1783_s12 + $0x78] sm:$0xff]  ;;  %v858_v33 = vmul.f32 %v445_v23, %v445_v23  ;;  %s1916_s12 = scalar_lea.vmem [#allocation8], %s1791_s2  ;;  %s1358_s2 = sshll.u32 %s1610_s27, 6 }
  0x4b   : > { %v838_v28 = vadd.f32 %v446_v24, %v445_v23  ;;  %v875_v30 = vadd.f32 %v857_v27, %v856_v26  ;;  %v859_v34 = vmul.f32 %v446_v24, %v446_v24  ;;  %v847_v35 = vadd.f32 %v452_v32, %v451_v31  ;;  %s1025_s1 = scalar_lea.hbm %s2069_s6, %s1358_s2  ;;  %s1026_s7 = sshll.u32 %s1916_s12, 4  ;;  %s1027_s7 = int_to_ptr.vmem [resolvable:$true] %s1026_s7 }
  0x4c   : > { %v855_v38 = vmul.f32 %v442_v7, %v442_v7  ;;  %v860_v40 = vmul.f32 %v447_v8, %v447_v8  ;;  %v861_v41 = vmul.f32 %v448_v9, %v448_v9  ;;  %v864_v43 = vmul.f32 %v451_v31, %v451_v31  ;;  %s1028_s26 = sshll.u32 %s1025_s1, 4  ;;  %s1029_s26 = int_to_ptr.hbm [resolvable:$true] %s1028_s26 }
  0x4d   : > { %771 = vperm.xlu1 %1440, %v749_v56   ;;  %v878_v36 = vadd.f32 %v859_v34, %v858_v33  ;;  %v865_v44 = vmul.f32 %v452_v32, %v452_v32  ;;  %v862_v46 = vmul.f32 %v449_v17, %v449_v17  ;;  %v863_v47 = vmul.f32 %v450_v18, %v450_v18  ;;  %s1546_s30 = sshra.s32 %s1029_s26, 4  ;;  %s1547_s30 = int_to_ptr.hbm [resolvable:$true] %s1546_s30 }
  0x4e   : > { %781 = vperm.xlu2 %1441, %v751_v59   ;;  %v872_v39 = vadd.f32 %v855_v38, %v854_v37  ;;  %v881_v42 = vadd.f32 %v861_v41, %v860_v40  ;;  %s1548_s13 = scalar_lea.hbm %s1547_s30, 64  ;;  %p1553_p7 = scmp.lt.s32.totalorder %s1547_s30, %s2069_s6 }
  0x4f   : > { %v887_v45 = vadd.f32 %v865_v44, %v864_v43  ;;  %v884_v48 = vadd.f32 %v863_v47, %v862_v46  ;;  %p1549_p4 = scmp.ne.s32.totalorder %s1547_s30, %s1548_s13  ;;  %p1554_p8 = scmp.lt.s32.totalorder %s1552_s11, %s1548_s13 }
  0x51   : > { %p1550_p5 = pnand %p1549_p4, %p1723_p9  ;;  %p1555_p10 = por %p1554_p8, %p1553_p7 }
  0x52   : > { %786 = vperm.xlu0 %1439, %v752_v55  }
  0x53   : > { %p1551_p6 = pneg %p1550_p5 }
  0x55   : > { %791 = vperm.xlu1 %1440, %v753_v60   ;;  %p1556_p13 = pnand %p1555_p10, %p1551_p6 }
  0x57   : > { %1318 = vmatmul.msk.bf16.gmra.mxu2 %vm545_vm0, %v1335_v58 }
  0x58   : > { %1262 = vmatmul.msk.bf16.gmra.mxu0 %vm545_vm0, %v1347_v57 }
  0x59   : > { %1266 = vmatmul.msk.bf16.gmra.mxu1 %vm545_vm0, %v1347_v57 }
  0x5a   : > { %1322 = vmatmul.msk.bf16.gmra.mxu3 %vm545_vm0, %v1335_v58 }
  0x67   : > { %1319 = vmatmul.msk.bf16.gmra.mxu2 %vm545_vm0, %v1336_v62 }
  0x68   : > { %1263 = vmatmul.msk.bf16.gmra.mxu0 %vm545_vm0, %v1348_v61 }
  0x69   : > { %1267 = vmatmul.msk.bf16.gmra.mxu1 %vm545_vm0, %v1348_v61 }
  0x6a   : > { %1323 = vmatmul.msk.bf16.gmra.mxu3 %vm545_vm0, %v1336_v62 }
  0x77   : > { %1320 = vmatmul.msk.bf16.gmra.mxu2 %vm545_vm0, %v1337_v0  ;;  %827 = vadd.xlane.f32.xlu2 %v826_v10 }
  0x78   : > { %1264 = vmatmul.msk.bf16.gmra.mxu0 %vm545_vm0, %v1349_v63 }
  0x79   : > { %1268 = vmatmul.msk.bf16.gmra.mxu1 %vm545_vm0, %v1349_v63 }
  0x7a   : > { %1324 = vmatmul.msk.bf16.gmra.mxu3 %vm545_vm0, %v1337_v0 }
  0x7c   : > { %830 = vadd.xlane.f32.xlu0 %v829_v3 }
  0x7f   : > { %833 = vadd.xlane.f32.xlu1 %v832_v11  ;;  %836 = vadd.xlane.f32.xlu2 %v835_v19 }
  0x84   : > { %842 = vadd.xlane.f32.xlu0 %v841_v12 }
  0x87   : > { %845 = vadd.xlane.f32.xlu1 %v844_v20  ;;  %839 = vadd.xlane.f32.xlu2 %v838_v28 }
  0x8c   : > { %867 = vadd.xlane.f32.xlu0 %v866_v21 }
  0x8f   : > { %870 = vadd.xlane.f32.xlu1 %v869_v29  ;;  %848 = vadd.xlane.f32.xlu2 %v847_v35 }
  0x94   : > { %876 = vadd.xlane.f32.xlu0 %v875_v30 }
  0x97   : > { %879 = vadd.xlane.f32.xlu1 %v878_v36  ;;  %873 = vadd.xlane.f32.xlu2 %v872_v39 }
  0x9c   : > { %885 = vadd.xlane.f32.xlu0 %v884_v48 }
  0x9f   : > { %882 = vadd.xlane.f32.xlu2 %v881_v42  ;;  %888 = vadd.xlane.f32.xlu1 %v887_v45 }
  0xa0   : > { %v777_v31 = vpop.permute.xlu2 %776 }
  0xa8   : > { %v782_v48 = vpop.permute.xlu2 %781 }
  0xb4   : > { %v757_v51 = vpop.permute.xlu0 %756 }
  0xb7   : > { %v767_v14 = vpop.permute.xlu1 %766 }
  0xbc   : > { %v762_v2 = vpop.permute.xlu0 %761 }
  0xbf   : > { %v772_v30 = vpop.permute.xlu1 %771 }
  0xc5   : > { %v567_v49 = vpop.f32.mrf.mxu0 }
  0xc6   : > { %v596_v50 = vpop.f32.mrf.mxu1 }
  0xca   : > { %v697_v52 = vpop.f32.mrf.mxu2 }
  0xcb   : > { %v698_v53 = vadd.f32 %v697_v52, %v567_v49 }
  0xcd   : > { %v726_v54 = vpop.f32.mrf.mxu3  ;;  %v569_v55 = vpop.f32.mrf.mxu0  ;;  %v794_v58 = vadd.f32 %v757_v51, %v698_v53 }
  0xce   : > { %v727_v56 = vadd.f32 %v726_v54, %v596_v50  ;;  %v598_v57 = vpop.f32.mrf.mxu1 }
  0xcf   : > { %v914_v60 = vmul.f32 %v794_v58, %v794_v58 }
  0xd0   : > { %v795_v59 = vadd.f32 %v757_v51, %v727_v56 }
  0xd2   : > { %v810_v61 = vpack.c.bf16 %v795_v59, %v794_v58  ;;  %v890_v62 = vadd.f32 %v795_v59, %v794_v58  ;;  %v915_v63 = vmul.f32 %v795_v59, %v795_v59  ;;  %v699_v0 = vpop.f32.mrf.mxu2 }
  0xd3   : > { %v700_v3 = vadd.f32 %v699_v0, %v569_v55 }
  0xd4   : > { %818 = vst [vmem:[%s1916_s12] sm:$0xff] %v810_v61  ;;  %891 = vadd.xlane.f32.xlu2 %v890_v62  ;;  %v930_v1 = vadd.f32 %v915_v63, %v914_v60 }
  0xd5   : > { %v728_v4 = vpop.f32.mrf.mxu3  ;;  %v572_v5 = vpop.f32.mrf.mxu0  ;;  %v796_v8 = vadd.f32 %v762_v2, %v700_v3 }
  0xd6   : > { %v729_v6 = vadd.f32 %v728_v4, %v598_v57  ;;  %931 = vadd.xlane.f32.xlu1 %v930_v1  ;;  %v601_v7 = vpop.f32.mrf.mxu1 }
  0xd7   : > { %v916_v10 = vmul.f32 %v796_v8, %v796_v8 }
  0xd8   : > { %v797_v9 = vadd.f32 %v762_v2, %v729_v6 }
  0xda   : > { %v811_v11 = vpack.c.bf16 %v797_v9, %v796_v8  ;;  %v893_v12 = vadd.f32 %v797_v9, %v796_v8  ;;  %v917_v13 = vmul.f32 %v797_v9, %v797_v9  ;;  %v702_v15 = vpop.f32.mrf.mxu2  ;;  %v787_v8 = vpop.permute.xlu0 %786 }
  0xdb   : > { %v703_v17 = vadd.f32 %v702_v15, %v572_v5 }
  0xdc   : > { %819 = vst [vmem:[%s1916_s12 + $0x8] sm:$0xff] %v811_v11  ;;  %894 = vadd.xlane.f32.xlu0 %v893_v12  ;;  %v933_v16 = vadd.f32 %v917_v13, %v916_v10 }
  0xdd   : > { %v731_v18 = vpop.f32.mrf.mxu3  ;;  %v574_v19 = vpop.f32.mrf.mxu0  ;;  %v798_v22 = vadd.f32 %v767_v14, %v703_v17 }
  0xde   : > { %v732_v20 = vadd.f32 %v731_v18, %v601_v7  ;;  %934 = vadd.xlane.f32.xlu2 %v933_v16  ;;  %v603_v21 = vpop.f32.mrf.mxu1 }
  0xdf   : > { %v918_v24 = vmul.f32 %v798_v22, %v798_v22 }
  0xe0   : > { %v799_v23 = vadd.f32 %v767_v14, %v732_v20 }
  0xe2   : > { %v812_v25 = vpack.c.bf16 %v799_v23, %v798_v22  ;;  %v896_v26 = vadd.f32 %v799_v23, %v798_v22  ;;  %v919_v27 = vmul.f32 %v799_v23, %v799_v23  ;;  %v704_v28 = vpop.f32.mrf.mxu2  ;;  %v792_v23 = vpop.permute.xlu1 %791 }
  0xe3   : > { %v705_v32 = vadd.f32 %v704_v28, %v574_v19 }
  0xe4   : > { %820 = vst [vmem:[%s1916_s12 + $0x10] sm:$0xff] %v812_v25  ;;  %897 = vadd.xlane.f32.xlu1 %v896_v26  ;;  %v936_v29 = vadd.f32 %v919_v27, %v918_v24 }
  0xe5   : > { %v733_v33 = vpop.f32.mrf.mxu3  ;;  %v577_v35 = vpop.f32.mrf.mxu0  ;;  %v800_v36 = vadd.f32 %v772_v30, %v705_v32 }
  0xe6   : > { %v734_v34 = vadd.f32 %v733_v33, %v603_v21  ;;  %937 = vadd.xlane.f32.xlu0 %v936_v29  ;;  %v606_v37 = vpop.f32.mrf.mxu1 }
  0xe7   : > { %v920_v39 = vmul.f32 %v800_v36, %v800_v36 }
  0xe8   : > { %v801_v38 = vadd.f32 %v772_v30, %v734_v34 }
  0xea   : > { %v813_v40 = vpack.c.bf16 %v801_v38, %v800_v36  ;;  %v899_v41 = vadd.f32 %v801_v38, %v800_v36  ;;  %v921_v42 = vmul.f32 %v801_v38, %v801_v38  ;;  %v707_v43 = vpop.f32.mrf.mxu2  ;;  %v1925_v63 = vpop.xlane.xlu2 %827 }
  0xeb   : > { %v708_v45 = vadd.f32 %v707_v43, %v577_v35 }
  0xec   : > { %821 = vst [vmem:[%s1916_s12 + $0x18] sm:$0xff] %v813_v40  ;;  %900 = vadd.xlane.f32.xlu2 %v899_v41  ;;  %v939_v44 = vadd.f32 %v921_v42, %v920_v39 }
  0xed   : > { %v736_v46 = vpop.f32.mrf.mxu3  ;;  %v802_v49 = vadd.f32 %v777_v31, %v708_v45  ;;  %v579_v51 = vpop.f32.mrf.mxu0 }
  0xee   : > { %v737_v47 = vadd.f32 %v736_v46, %v606_v37  ;;  %940 = vadd.xlane.f32.xlu1 %v939_v44  ;;  %v608_v52 = vpop.f32.mrf.mxu1 }
  0xef   : > { %v922_v53 = vmul.f32 %v802_v49, %v802_v49 }
  0xf0   : > { %v803_v50 = vadd.f32 %v777_v31, %v737_v47 }
  0xf2   : > { %v814_v54 = vpack.c.bf16 %v803_v50, %v802_v49  ;;  %v902_v55 = vadd.f32 %v803_v50, %v802_v49  ;;  %v923_v56 = vmul.f32 %v803_v50, %v803_v50  ;;  %v709_v57 = vpop.f32.mrf.mxu2  ;;  %v1934_v11 = vpop.xlane.xlu2 %836 }
  0xf3   : > { %v710_v59 = vadd.f32 %v709_v57, %v579_v51 }
  0xf4   : > { %822 = vst [vmem:[%s1916_s12 + $0x20] sm:$0xff] %v814_v54  ;;  %903 = vadd.xlane.f32.xlu0 %v902_v55  ;;  %v942_v58 = vadd.f32 %v923_v56, %v922_v53 }
  0xf5   : > { %v738_v60 = vpop.f32.mrf.mxu3  ;;  %v1923_v62 = vadd.f32 %v782_v48, %v710_v59  ;;  %v582_v2 = vpop.f32.mrf.mxu0 }
  0xf6   : > { %v739_v61 = vadd.f32 %v738_v60, %v608_v52  ;;  %943 = vadd.xlane.f32.xlu2 %v942_v58  ;;  %v611_v4 = vpop.f32.mrf.mxu1 }
  0xf8   : > { %v1927_v0 = vadd.f32 %v782_v48, %v739_v61 }
  0xfa   : > { %v815_v1 = vpack.c.bf16 %v1927_v0, %v1923_v62  ;;  %v905_v3 = vadd.f32 %v1927_v0, %v1923_v62  ;;  %v712_v5 = vpop.f32.mrf.mxu2  ;;  %v1937_v26 = vpop.xlane.xlu2 %839 }
  0xfb   : > { %v713_v6 = vadd.f32 %v712_v5, %v582_v2 }
  0xfc   : > { %823 = vst [vmem:[%s1916_s12 + $0x28] sm:$0xff] %v815_v1  ;;  %906 = vadd.xlane.f32.xlu1 %v905_v3 }
  0xfd   : > { %v741_v7 = vpop.f32.mrf.mxu3  ;;  %v806_v10 = vadd.f32 %v787_v8, %v713_v6  ;;  %v584_v17 = vpop.f32.mrf.mxu0 }
  0xfe   : > { %v742_v9 = vadd.f32 %v741_v7, %v611_v4  ;;  %v613_v20 = vpop.f32.mrf.mxu1 }
  0xff   : > { %v926_v13 = vmul.f32 %v806_v10, %v806_v10 }
 0x100   : > { %v807_v12 = vadd.f32 %v787_v8, %v742_v9 }
 0x102   : > { %v816_v14 = vpack.c.bf16 %v807_v12, %v806_v10  ;;  %v908_v15 = vadd.f32 %v807_v12, %v806_v10  ;;  %v927_v16 = vmul.f32 %v807_v12, %v807_v12  ;;  %v714_v18 = vpop.f32.mrf.mxu2 }
 0x103   : > { %v715_v21 = vadd.f32 %v714_v18, %v584_v17 }
 0x104   : > { %824 = vst [vmem:[%s1916_s12 + $0x30] sm:$0xff] %v816_v14  ;;  %909 = vadd.xlane.f32.xlu2 %v908_v15  ;;  %v948_v19 = vadd.f32 %v927_v16, %v926_v13 }
 0x105   : > { %v743_v22 = vpop.f32.mrf.mxu3  ;;  %v808_v25 = vadd.f32 %v792_v23, %v715_v21 }
 0x106   : > { %v744_v24 = vadd.f32 %v743_v22, %v613_v20  ;;  %949 = vadd.xlane.f32.xlu1 %v948_v19 }
 0x107   : > { %v928_v28 = vmul.f32 %v808_v25, %v808_v25 }
 0x108   : > { %v809_v27 = vadd.f32 %v792_v23, %v744_v24 }
 0x10a   : > { %v817_v29 = vpack.c.bf16 %v809_v27, %v808_v25  ;;  %v911_v30 = vadd.f32 %v809_v27, %v808_v25  ;;  %v929_v31 = vmul.f32 %v809_v27, %v809_v27 }
 0x10c   : > { %825 = vst [vmem:[%s1916_s12 + $0x38] sm:$0xff] %v817_v29  ;;  %912 = vadd.xlane.f32.xlu0 %v911_v30  ;;  %v951_v32 = vadd.f32 %v929_v31, %v928_v28 }
 0x10d   : > { %1559 = shalt.err (!%p1556_p13)
}
 0x10e   : > { %s1625_s28 = smov 128   ;;  %s1626_s24 = smov 8   ;;  %952 = vadd.xlane.f32.xlu2 %v951_v32  ;;  %v924_v33 = vmul.f32 %v1923_v62, %v1923_v62  ;;  %v925_v34 = vmul.f32 %v1927_v0, %v1927_v0  ;;  %v1960_v35 = vpop.xlane.xlu2 %848  ;;  %v831_v37 = vpop.xlane.xlu0 %830  ;;  %vm954_vm1 = vcmask 7168   ;;  %vm428_vm2 = vcmask 31744  }
 0x10f   : > { %1365 = dma.vmem_to_hbm [thread:$0]  (%p1723_p9), %s1027_s7, 1024, %s1029_s26, %s1007_s15, %s1625_s28, %s1625_s28, %s1626_s24   ;;  %v834_v38 = vpop.xlane.xlu1 %833  ;;  %v1627_v44 = vmov 0.0   ;;  %vm963_vm3 = vcmask 15360   ;;  %vm972_vm4 = vcmask 23552  }
 0x110   : > { %v945_v36 = vadd.f32 %v925_v34, %v924_v33  ;;  %p418_p0 = scmp.lt.s32.totalorder %s1610_s27, 1  ;;  %s2093_s19 = sld [smem:[#allocation20_spill]] }
 0x112   : > { %s2105_s27 = smov (!%p418_p0, %s1610_s27), 1 }
 0x113   : > { %s1333_s16 = sshll.u32 %s2105_s27, 6 }
 0x114   : > { %946 = vadd.xlane.f32.xlu0 %v945_v36 }
 0x116   : > { %v874_v39 = vpop.xlane.xlu2 %873  ;;  %v843_v40 = vpop.xlane.xlu0 %842  ;;  %s1970_s22 = scalar_lea.vmem %s2093_s19, %s1333_s16 }
 0x117   : > { %v846_v43 = vpop.xlane.xlu1 %845  ;;  %429 = vst.msk [vmem:[%s1970_s22] sm:$0xff] %vm428_vm2, %v1627_v44  ;;  %v957_v1 = vsel %vm954_vm1, %v834_v38, %v874_v39 }
 0x118   : > { %430 = vst.msk [vmem:[%s1970_s22 + $0x8] sm:$0xff] %vm428_vm2, %v1627_v44 }
 0x119   : > { %431 = vst.msk [vmem:[%s1970_s22 + $0x10] sm:$0xff] %vm428_vm2, %v1627_v44 }
 0x11a   : > { %432 = vst.msk [vmem:[%s1970_s22 + $0x18] sm:$0xff] %vm428_vm2, %v1627_v44 }
 0x11b   : > { %433 = vst.msk [vmem:[%s1970_s22 + $0x20] sm:$0xff] %vm428_vm2, %v1627_v44 }
 0x11c   : > { %434 = vst.msk [vmem:[%s1970_s22 + $0x28] sm:$0xff] %vm428_vm2, %v1627_v44 }
 0x11d   : > { %435 = vst.msk [vmem:[%s1970_s22 + $0x30] sm:$0xff] %vm428_vm2, %v1627_v44 }
 0x11e   : > { %v883_v41 = vpop.xlane.xlu2 %882  ;;  %436 = vst.msk [vmem:[%s1970_s22 + $0x38] sm:$0xff] %vm428_vm2, %v1627_v44  ;;  %v868_v46 = vpop.xlane.xlu0 %867  ;;  %v981_v54 = vld [vmem:[%s1970_s22] sm:$0xff] }
 0x11f   : > { %v1965_v42 = vsel %vm954_vm1, %v843_v40, %v883_v41  ;;  %v871_v45 = vpop.xlane.xlu1 %870  ;;  %v955_v51 = vsel %vm954_vm1, %v1925_v63, %v868_v46  ;;  %v982_v61 = vld [vmem:[%s1970_s22 + $0x8] sm:$0xff] }
 0x120   : > { %v956_v58 = vsel %vm954_vm1, %v831_v37, %v871_v45  ;;  %v983_v4 = vld [vmem:[%s1970_s22 + $0x10] sm:$0xff] }
 0x121   : > { %v984_v12 = vld [vmem:[%s1970_s22 + $0x18] sm:$0xff] }
 0x122   : > { %v985_v19 = vld [vmem:[%s1970_s22 + $0x20] sm:$0xff] }
 0x123   : > { %v986_v38 = vld [vmem:[%s1970_s22 + $0x28] sm:$0xff] }
 0x125   : > { %v988_v33 = vld [vmem:[%s1970_s22 + $0x38] sm:$0xff] }
 0x126   : > { %v877_v48 = vpop.xlane.xlu0 %876 }
 0x127   : > { %v880_v47 = vpop.xlane.xlu1 %879  ;;  %v958_v8 = vsel %vm954_vm1, %v1934_v11, %v877_v48 }
 0x128   : > { %v959_v16 = vsel %vm954_vm1, %v1937_v26, %v880_v47  ;;  %v987_v26 = vld [vmem:[%s1970_s22 + $0x30] sm:$0xff] }
 0x12e   : > { %v886_v50 = vpop.xlane.xlu0 %885 }
 0x12f   : > { %v889_v49 = vpop.xlane.xlu1 %888  ;;  %v961_v23 = vsel %vm954_vm1, %v846_v43, %v886_v50 }
 0x130   : > { %v962_v30 = vsel %vm954_vm1, %v1960_v35, %v889_v49 }
 0x147   : > { %v892_v52 = vpop.xlane.xlu2 %891 }
 0x148   : > { %v964_v53 = vsel %vm963_vm3, %v955_v51, %v892_v52 }
 0x149   : > { %v932_v55 = vpop.xlane.xlu1 %931 }
 0x14a   : > { %v973_v56 = vsel %vm972_vm4, %v964_v53, %v932_v55 }
 0x14b   : > { %v989_v57 = vadd.f32 %v981_v54, %v973_v56 }
 0x14d   : > { %998 = vst.msk [vmem:[%s1970_s22] sm:$0xff] %vm428_vm2, %v989_v57 }
 0x14f   : > { %v895_v59 = vpop.xlane.xlu0 %894 }
 0x150   : > { %v965_v60 = vsel %vm963_vm3, %v956_v58, %v895_v59 }
 0x151   : > { %v935_v62 = vpop.xlane.xlu2 %934 }
 0x152   : > { %v974_v63 = vsel %vm972_vm4, %v965_v60, %v935_v62 }
 0x153   : > { %v990_v0 = vadd.f32 %v982_v61, %v974_v63 }
 0x155   : > { %999 = vst.msk [vmem:[%s1970_s22 + $0x8] sm:$0xff] %vm428_vm2, %v990_v0 }
 0x157   : > { %v898_v2 = vpop.xlane.xlu1 %897 }
 0x158   : > { %v966_v3 = vsel %vm963_vm3, %v957_v1, %v898_v2 }
 0x159   : > { %v938_v5 = vpop.xlane.xlu0 %937 }
 0x15a   : > { %v975_v6 = vsel %vm972_vm4, %v966_v3, %v938_v5 }
 0x15b   : > { %v991_v7 = vadd.f32 %v983_v4, %v975_v6 }
 0x15d   : > { %1000 = vst.msk [vmem:[%s1970_s22 + $0x10] sm:$0xff] %vm428_vm2, %v991_v7 }
 0x15f   : > { %v901_v9 = vpop.xlane.xlu2 %900 }
 0x160   : > { %v967_v10 = vsel %vm963_vm3, %v958_v8, %v901_v9 }
 0x161   : > { %v941_v13 = vpop.xlane.xlu1 %940 }
 0x162   : > { %v976_v14 = vsel %vm972_vm4, %v967_v10, %v941_v13 }
 0x163   : > { %v992_v15 = vadd.f32 %v984_v12, %v976_v14 }
 0x165   : > { %1001 = vst.msk [vmem:[%s1970_s22 + $0x18] sm:$0xff] %vm428_vm2, %v992_v15 }
 0x167   : > { %v904_v17 = vpop.xlane.xlu0 %903 }
 0x168   : > { %v968_v18 = vsel %vm963_vm3, %v959_v16, %v904_v17 }
 0x169   : > { %v944_v11 = vpop.xlane.xlu2 %943 }
 0x16a   : > { %v977_v20 = vsel %vm972_vm4, %v968_v18, %v944_v11 }
 0x16b   : > { %v993_v21 = vadd.f32 %v985_v19, %v977_v20 }
 0x16d   : > { %1002 = vst.msk [vmem:[%s1970_s22 + $0x20] sm:$0xff] %vm428_vm2, %v993_v21 }
 0x16f   : > { %v907_v22 = vpop.xlane.xlu1 %906 }
 0x170   : > { %v969_v39 = vsel %vm963_vm3, %v1965_v42, %v907_v22 }
 0x177   : > { %v910_v24 = vpop.xlane.xlu2 %909 }
 0x178   : > { %v970_v25 = vsel %vm963_vm3, %v961_v23, %v910_v24 }
 0x179   : > { %v950_v27 = vpop.xlane.xlu1 %949 }
 0x17a   : > { %v979_v28 = vsel %vm972_vm4, %v970_v25, %v950_v27 }
 0x17b   : > { %v995_v29 = vadd.f32 %v987_v26, %v979_v28 }
 0x17d   : > { %1004 = vst.msk [vmem:[%s1970_s22 + $0x30] sm:$0xff] %vm428_vm2, %v995_v29 }
 0x17f   : > { %v913_v31 = vpop.xlane.xlu0 %912 }
 0x180   : > { %v971_v32 = vsel %vm963_vm3, %v962_v30, %v913_v31 }
 0x181   : > { %v953_v34 = vpop.xlane.xlu2 %952 }
 0x182   : > { %v980_v36 = vsel %vm972_vm4, %v971_v32, %v953_v34 }
 0x183   : > { %v996_v37 = vadd.f32 %v988_v33, %v980_v36 }
 0x185   : > { %1005 = vst.msk [vmem:[%s1970_s22 + $0x38] sm:$0xff] %vm428_vm2, %v996_v37 }
 0x187   : > { %v947_v40 = vpop.xlane.xlu0 %946 }
 0x188   : > { %v978_v41 = vsel %vm972_vm4, %v969_v39, %v947_v40 }
 0x189   : > { %v994_v43 = vadd.f32 %v986_v38, %v978_v41 }
 0x18b   : > { %1003 = vst.msk [vmem:[%s1970_s22 + $0x28] sm:$0xff] %vm428_vm2, %v994_v43 }
 0x18c PF: > { %s2094_s27 = sld [smem:[#allocation12_spill]]  ;;  %p1378_p9 = pnand %p1196_p12, %p1730_p11 }
 0x18e   : > { %p1379_p1 = pneg %p1378_p9 }
 0x192   : > { %s1046_s12 = sand.u32 1, %s2094_s27  }
 0x193   : > { %s1047_s2 = scalar_lea.sflag [#allocation4], %s1046_s12 }
 0x194   : > { %1593 = dma.done.wait (%p1379_p1), %s1047_s2, 1024  }
 0x195   : > { %1595 = vsyncadd (%p1379_p1), %s1047_s2, 4294966272  ;;  %s27_s29 = sadd.s32 1, %s1618_s29   ;;  %s2096_s9 = sld [smem:[#allocation13_spill]] }
 0x196   : > { %p24_p2 = scmp.ge.s32.totalorder %s27_s29, 4   ;;  %s2097_s26 = sld [smem:[#allocation16_spill]] }
 0x197   : > { %s2098_s27 = sld [smem:[#allocation14_spill]]  ;;  %s2100_s24 = smov %s1602_s25 }
 0x198   : > { %s2099_s28 = sld [smem:[#allocation15_spill]]  ;;  %26 = sbr.rel (!%p24_p2) target bundleno = 12 (0xc), region = 129 }
 0x19b   : > { %s2101_s25 = smov %s2096_s9 }
 0x19d   :  { %1061 = vsyncpa [#allocation3], 1 }
 0x19e   :  { %1063 = vsyncpa [#allocation3 + $0x1], 1 }
 0x19f   :  { %1064 = vsyncpa [#allocation6], 1 }
 0x1a0   :  { %1066 = vsyncpa [#allocation6 + $0x1], 1 }
 0x1a1   :  { %1067 = vsyncpa [#allocation4], 1 }
 0x1a2   :  { %1069 = vsyncpa [#allocation4 + $0x1], 1 }

</bundles_post_ra>
